<compile_context>
chip_gen: v7x
topology: tpu7x:2x2x1
jax: 0.10.0
libtpu: 0.0.40
codegen_flags: <defaults>
</compile_context>

<pallas_src>
import functools

import jax
import jax.numpy as jnp
from jax.experimental import pallas as pl
from jax.experimental.pallas import tpu as pltpu


# ---------------- Pallas kernel ----------------

def _upblock_kernel(x1_ref, x2_ref, wx1_ref, wx2_ref, b_ref, o_ref, *,
                    ch, split_x2, fuse_x1):
    # x1_ref : (1, TH*W, Cin)         rows ordered (i, j), compute dtype (bf16/f32)
    # x2_ref : (1, TH, 2, W, 2*Ch)    [i, di, j, (dj, c)], compute dtype
    # wx1_ref: (Cin, 4*Cout)          columns ordered (di, dj, o)   (folded ConvT x W1_up)
    # wx2_ref: (Ch, Cout)  if split_x2 else (2*Ch, 2*Cout) block-diag(W1_x2, W1_x2)
    # b_ref  : (1, 4*Cout)            combined bias, f32, tiled over (di, dj)
    # o_ref  : (1, TH, 2, W, 2*Cout)  [i, di, j, (dj, o)]
    _, TH, _, W, C2out = o_ref.shape
    rows = TH * W

    x1f = x1_ref[0]                    # (rows, Cin)
    bias4 = b_ref[...]                 # (1, 4*Cout), f32

    if fuse_x1:
        # One MXU op for both output-row parities; bias broadcast hoisted out of the di loop.
        up_all = jnp.dot(x1f, wx1_ref[...],
                         preferred_element_type=jnp.float32) + bias4   # (rows, 4*Cout) f32

    for di in range(2):                # static unroll
        if fuse_x1:
            up = up_all[:, di * C2out:(di + 1) * C2out]                 # (rows, 2*Cout) f32
        else:
            up = jnp.dot(x1f, wx1_ref[:, di * C2out:(di + 1) * C2out],
                         preferred_element_type=jnp.float32)
            up = up + bias4[:, di * C2out:(di + 1) * C2out]

        # Skip (x2) path, per di only -> smaller live intermediates.
        x2di = x2_ref[0, :, di, :, :].reshape(rows, 2 * ch)             # (rows, 2*Ch)
        if split_x2:
            w = wx2_ref[...]                                            # (Ch, Cout)
            skip = jnp.concatenate(
                [jnp.dot(x2di[:, dj * ch:(dj + 1) * ch], w,
                         preferred_element_type=jnp.float32)
                 for dj in range(2)], axis=-1)                          # (rows, 2*Cout) f32
        else:
            skip = jnp.dot(x2di, wx2_ref[...],
                           preferred_element_type=jnp.float32)          # (rows, 2*Cout) f32

        out_di = (up + skip).reshape(TH, W, C2out)
        o_ref[0, :, di, :, :] = out_di.astype(o_ref.dtype)


# ---------------- tiling / VMEM helpers ----------------

def _vmem_capacity_bytes():
    try:
        info = pltpu.get_tpu_info()
        cap = getattr(info, "vmem_capacity_bytes", None)
        if cap:
            return int(cap)
    except Exception:
        pass
    return 64 << 20   # conservative default (v7x per-TC size)


def _tile_bytes(th, W, Cin, Ch, Cout, ds, out_is):
    """Per-grid-step VMEM: double-buffered I/O blocks + in-kernel f32 intermediates."""
    rows = th * W
    act = 2 * rows * Cin * ds             # x1 block, 2x buffered
    act += 2 * 4 * rows * Ch * ds         # x2 block (th, 2, W, 2*Ch), 2x buffered
    act += 2 * 4 * rows * Cout * out_is   # out block (th, 2, W, 2*Cout), 2x buffered
    inter = rows * 4 * Cout * 4           # up_all (fused) or up+skip (per-di) in f32
    inter += rows * 2 * Cout * 4          # epilogue accumulator / cast staging
    inter += rows * 2 * Ch * ds           # per-di flattened x2 copy
    return act + inter


def _choose_tile_rows(B, H, W, Cin, Ch, Cout, ds, out_is, budget_bytes):
    """Largest sublane-aligned divisor of H that fits the budget; keep >=2 tiles when B==1."""
    aligned = [th for th in range(1, H + 1)
               if H % th == 0 and ((th * W) % 8 == 0 or th == H)]
    if not aligned:
        return H
    fitting = [th for th in aligned
               if _tile_bytes(th, W, Cin, Ch, Cout, ds, out_is) <= budget_bytes]
    if not fitting:
        return min(aligned)               # correctness first; smallest legal tile
    if B == 1:                            # keep both v7x TensorCores busy
        multi = [th for th in fitting if H // th >= 2]
        if multi:
            return max(multi)
    return max(fitting)


# ---------------- wrapper ----------------

def up_block_forward(x1, x2, params, *, tile_rows=None,
                     compute_dtype=jnp.bfloat16, out_dtype=jnp.float32,
                     split_x2=None, fuse_x1=None):
    """x1: (B, H, W, Cin) NHWC, x2: (B, 2H, 2W, Cin//2) NHWC -> (B, 2H, 2W, Cout)."""
    B, H, W, Cin = x1.shape
    assert Cin % 2 == 0
    Ch = Cin // 2
    H2, W2 = 2 * H, 2 * W
    assert x2.shape == (B, H2, W2, Ch), x2.shape

    wup = params["wup"].astype(jnp.float32)   # (Cin, Ch, 2, 2)  PyTorch ConvTranspose2d layout
    bup = params["bup"].astype(jnp.float32)   # (Ch,)
    w1 = params["w1"].astype(jnp.float32)     # (Cout, Cin)      PyTorch 1x1 Conv2d (squeezed)
    b1 = params["b1"].astype(jnp.float32)     # (Cout,)
    Cout = w1.shape[0]

    if fuse_x1 is None:
        fuse_x1 = (2 * Cout) <= 128                       # widen matmul only when MXU underfilled
    if split_x2 is None:
        split_x2 = (Ch % 128 == 0) and (Cout % 128 == 0)  # dense skip matmuls when lane-aligned

    ds = jnp.dtype(compute_dtype).itemsize
    out_is = jnp.dtype(out_dtype).itemsize

    # ---- fold weights in f32 (one-time, wrapper side), cast matmul operands to compute dtype ----
    w1_x2 = jnp.transpose(w1[:, :Ch])                     # (Ch, Cout): acts on x2 (first in concat)
    w1_up = jnp.transpose(w1[:, Ch:])                     # (Ch, Cout): acts on upsampled x1
    wcomb = jnp.einsum("ckij,ko->cijo", wup, w1_up)       # (Cin, 2, 2, Cout) = [c, di, dj, o]
    wx1 = wcomb.reshape(Cin, 4 * Cout).astype(compute_dtype)        # columns ordered (di, dj, o)
    if split_x2:
        wx2 = w1_x2.astype(compute_dtype)                           # (Ch, Cout)
    else:
        wx2 = jnp.kron(jnp.eye(2, dtype=jnp.float32), w1_x2).astype(compute_dtype)  # (2Ch, 2Cout)
    bias4 = jnp.tile(b1 + bup @ w1_up, 4)[None, :]        # (1, 4*Cout), f32, columns (di, dj, o)

    # ---- free (contiguous) relayouts of the activations ----
    x1_flat = x1.reshape(B, H * W, Cin).astype(compute_dtype)
    x2_r = x2.reshape(B, H, 2, W, 2 * Ch).astype(compute_dtype)     # [b, i, di, j, (dj, c)]

    # ---- generation-aware tiling & VMEM accounting ----
    cap = _vmem_capacity_bytes()
    wgt_bytes = 2 * (int(wx1.size) * ds + int(wx2.size) * ds + int(bias4.size) * 4)  # 2x buffered
    budget = max(int(0.40 * cap) - wgt_bytes, 2 << 20)

    if tile_rows is None:
        TH = _choose_tile_rows(B, H, W, Cin, Ch, Cout, ds, out_is, budget)
    else:
        TH = int(tile_rows)
    assert H % TH == 0, (H, TH)
    assert (TH * W) % 8 == 0 or TH == H, "x1 block must be sublane-aligned or full"
    n_tiles = H // TH

    need = _tile_bytes(TH, W, Cin, Ch, Cout, ds, out_is) + wgt_bytes
    vmem_limit = int(min(max(1.8 * need + (8 << 20), 32 << 20), 0.92 * cap))

    x1_flops = 2 * B * H * W * Cin * 4 * Cout
    x2_flops = 2 * B * H * W * 2 * (2 if split_x2 else 4) * Ch * Cout
    bytes_accessed = int((int(x1_flat.size) + int(x2_r.size)) * ds
                         + B * H2 * W2 * Cout * out_is
                         + (int(wx1.size) + int(wx2.size)) * ds + int(bias4.size) * 4)

    kernel = functools.partial(_upblock_kernel, ch=Ch, split_x2=split_x2, fuse_x1=fuse_x1)

    out5 = pl.pallas_call(
        kernel,
        out_shape=jax.ShapeDtypeStruct((B, H, 2, W, 2 * Cout), out_dtype),
        grid_spec=pltpu.PrefetchScalarGridSpec(
            num_scalar_prefetch=0,
            grid=(B, n_tiles),
            in_specs=[
                pl.BlockSpec((1, TH * W, Cin), lambda b, t: (b, t, 0)),
                pl.BlockSpec((1, TH, 2, W, 2 * Ch), lambda b, t: (b, t, 0, 0, 0)),
                pl.BlockSpec((Cin, 4 * Cout), lambda b, t: (0, 0)),    # resident weight
                pl.BlockSpec(tuple(wx2.shape), lambda b, t: (0, 0)),   # resident weight
                pl.BlockSpec((1, 4 * Cout), lambda b, t: (0, 0)),      # resident bias
            ],
            out_specs=pl.BlockSpec((1, TH, 2, W, 2 * Cout), lambda b, t: (b, t, 0, 0, 0)),
        ),
        compiler_params=pltpu.CompilerParams(
            dimension_semantics=("parallel", "parallel"),
            vmem_limit_bytes=vmem_limit,
        ),
        cost_estimate=pl.CostEstimate(flops=int(x1_flops + x2_flops), transcendentals=0,
                                      bytes_accessed=bytes_accessed),
    )(x1_flat, x2_r, wx1, wx2, bias4)

    # (B, H, 2, W, 2*Cout) -> (B, 2H, 2W, Cout): contiguous reshape, no data movement.
    return out5.reshape(B, H2, W2, Cout)


# ---------------- pure-JAX reference (replicates PyTorch UpBlock semantics, NHWC) ----------------

def up_block_reference(x1, x2, params):
    B, H, W, Cin = x1.shape
    Ch = Cin // 2
    wup, bup, w1, b1 = params["wup"], params["bup"], params["w1"], params["b1"]
    # ConvTranspose2d, k=2, s=2
    t = jnp.einsum("nhwc,coij->nhiwjo", x1, wup)                  # (B, H, 2, W, 2, Ch)
    up = t.reshape(B, 2 * H, 2 * W, Ch) + bup
    cat = jnp.concatenate([x2, up], axis=-1)                      # [x2, x1] order, like torch.cat
    return jnp.einsum("nhwc,oc->nhwo", cat, w1) + b1


if __name__ == "__main__":
    key = jax.random.PRNGKey(0)

    def make_case(k, B, H, W, Cin, Cout):
        k1, k2, k3, k4, k5, k6 = jax.random.split(k, 6)
        Ch = Cin // 2
        x1 = jax.random.normal(k1, (B, H, W, Cin), dtype=jnp.float32)
        x2 = jax.random.normal(k2, (B, 2 * H, 2 * W, Ch), dtype=jnp.float32)
        params = {
            # ConvTranspose2d(in_channels, in_channels//2, kernel_size=2, stride=2)
            "wup": 0.1 * jax.random.normal(k3, (Cin, Ch, 2, 2), dtype=jnp.float32),
            "bup": 0.1 * jax.random.normal(k4, (Ch,), dtype=jnp.float32),
            # Conv2d(in_channels, out_channels, kernel_size=1) -> weight (Cout, Cin, 1, 1) squeezed
            "w1": 0.1 * jax.random.normal(k5, (Cout, Cin), dtype=jnp.float32),
            "b1": 0.1 * jax.random.normal(k6, (Cout,), dtype=jnp.float32),
        }
        return x1, x2, params

    kA, kB = jax.random.split(key)

    # --- Case A: small toy shapes (batch=2, in_channels=4, out_channels=4, x1 spatial 8 -> 16) ---
    x1, x2, params = make_case(kA, B=2, H=8, W=8, Cin=4, Cout=4)
    ref = up_block_reference(x1, x2, params)

    # A1: f32 compute, auto branches (fused x1 / block-diag x2), explicit 2-row tiles -> exact.
    out = up_block_forward(x1, x2, params, tile_rows=2, compute_dtype=jnp.float32)
    jax.block_until_ready(out)
    assert out.shape == ref.shape
    assert jnp.allclose(out, ref, rtol=1e-5, atol=1e-5), "mismatch (f32, fused/block-diag)"

    # A2: f32 compute, forced non-fused x1 / split x2 branches, auto tile -> exact.
    out = up_block_forward(x1, x2, params, compute_dtype=jnp.float32,
                           split_x2=True, fuse_x1=False)
    jax.block_until_ready(out)
    assert jnp.allclose(out, ref, rtol=1e-5, atol=1e-5), "mismatch (f32, split/non-fused)"

    # A3: default bf16 compute (f32 accumulation) -> loose check vs f32 reference.
    out = up_block_forward(x1, x2, params)
    jax.block_until_ready(out)
    assert jnp.allclose(out, ref, rtol=0.05, atol=0.1), "mismatch (bf16, toy)"

    # --- Case B: larger channels (Cin=256 -> Ch=128, Cout=128), B=1: exercises lane-aligned
    #     split-x2 / non-fused-x1 fast path in bf16 and the >=2-tiles grid preference. ---
    x1b, x2b, paramsb = make_case(kB, B=1, H=8, W=8, Cin=256, Cout=128)
    refb = up_block_reference(x1b, x2b, paramsb)
    outb = up_block_forward(x1b, x2b, paramsb)
    jax.block_until_ready(outb)
    assert outb.shape == refb.shape
    assert jnp.allclose(outb, refb, rtol=0.05, atol=0.2), "mismatch (bf16, large channels)"

    print("KERNEL_OK")
</pallas_src>

<mosaic_0001>
module attributes {stable_mosaic.version = 11 : i64} {
  func.func @_upblock_kernel(%arg0: i32, %arg1: i32, %arg2: memref<1x16x4xf32, #tpu.memory_space<vmem>>, %arg3: memref<1x2x2x8x4xf32, #tpu.memory_space<vmem>>, %arg4: memref<4x16xf32, #tpu.memory_space<vmem>>, %arg5: memref<4x8xf32, #tpu.memory_space<vmem>>, %arg6: memref<1x16xf32, #tpu.memory_space<vmem>>, %arg7: memref<1x2x2x8x8xf32, #tpu.memory_space<vmem>>) attributes {dimension_semantics = [#tpu.dimension_semantics<parallel>, #tpu.dimension_semantics<parallel>], iteration_bounds = array<i64: 2, 4>, scalar_prefetch = 0 : i64, scratch_operands = 0 : i64, tpu.core_type = #tpu.core_type<tc>, window_params = [{transform_indices = @transform_0, window_bounds = array<i64: 1, 16, 4>}, {transform_indices = @transform_1, window_bounds = array<i64: 1, 2, 2, 8, 4>}, {pipeline_mode = #tpu.pipeline_mode<synchronous>, transform_indices = @transform_2, window_bounds = array<i64: 4, 16>}, {pipeline_mode = #tpu.pipeline_mode<synchronous>, transform_indices = @transform_3, window_bounds = array<i64: 4, 8>}, {pipeline_mode = #tpu.pipeline_mode<synchronous>, transform_indices = @transform_4, window_bounds = array<i64: 1, 16>}, {transform_indices = @transform_5, window_bounds = array<i64: 1, 2, 2, 8, 8>}]} {
    %c0 = arith.constant 0 : index
    %c0_0 = arith.constant 0 : index
    %c0_1 = arith.constant 0 : index
    %0 = vector.load %arg2[%c0, %c0_0, %c0_1] : memref<1x16x4xf32, #tpu.memory_space<vmem>>, vector<1x16x4xf32>
    %1 = vector.shape_cast %0 : vector<1x16x4xf32> to vector<16x4xf32>
    %c0_2 = arith.constant 0 : index
    %c0_3 = arith.constant 0 : index
    %2 = vector.load %arg6[%c0_2, %c0_3] : memref<1x16xf32, #tpu.memory_space<vmem>>, vector<1x16xf32>
    %c0_4 = arith.constant 0 : index
    %c0_5 = arith.constant 0 : index
    %3 = vector.load %arg4[%c0_4, %c0_5] : memref<4x16xf32, #tpu.memory_space<vmem>>, vector<4x16xf32>
    %cst = arith.constant dense<0.000000e+00> : vector<16x16xf32>
    %4 = tpu.matmul %1, %3, %cst {dimension_numbers = #tpu.dot_dimension_numbers<[1], [0], [0], [1], [0, 0, 1, 1], [], []>} : vector<16x4xf32>, vector<4x16xf32>, vector<16x16xf32> -> vector<16x16xf32>
    %5 = vector.broadcast %2 : vector<1x16xf32> to vector<16x16xf32>
    %6 = arith.addf %4, %5 : vector<16x16xf32>
    %7 = vector.extract_strided_slice %6 {offsets = [0, 0], sizes = [16, 8], strides = [1, 1]} : vector<16x16xf32> to vector<16x8xf32>
    %c0_6 = arith.constant 0 : index
    %c0_7 = arith.constant 0 : index
    %c0_8 = arith.constant 0 : index
    %c0_9 = arith.constant 0 : index
    %c0_10 = arith.constant 0 : index
    %8 = vector.load %arg3[%c0_6, %c0_7, %c0_8, %c0_9, %c0_10] : memref<1x2x2x8x4xf32, #tpu.memory_space<vmem>>, vector<1x2x1x8x4xf32>
    %9 = vector.shape_cast %8 : vector<1x2x1x8x4xf32> to vector<2x8x4xf32>
    %10 = vector.shape_cast %9 : vector<2x8x4xf32> to vector<16x4xf32>
    %c0_11 = arith.constant 0 : index
    %c0_12 = arith.constant 0 : index
    %11 = vector.load %arg5[%c0_11, %c0_12] : memref<4x8xf32, #tpu.memory_space<vmem>>, vector<4x8xf32>
    %cst_13 = arith.constant dense<0.000000e+00> : vector<16x8xf32>
    %12 = tpu.matmul %10, %11, %cst_13 {dimension_numbers = #tpu.dot_dimension_numbers<[1], [0], [0], [1], [0, 0, 1, 1], [], []>} : vector<16x4xf32>, vector<4x8xf32>, vector<16x8xf32> -> vector<16x8xf32>
    %13 = arith.addf %7, %12 : vector<16x8xf32>
    %14 = vector.shape_cast %13 : vector<16x8xf32> to vector<2x8x8xf32>
    %c0_14 = arith.constant 0 : index
    %c0_15 = arith.constant 0 : index
    %c0_16 = arith.constant 0 : index
    %c0_17 = arith.constant 0 : index
    %c0_18 = arith.constant 0 : index
    %15 = vector.load %arg7[%c0_14, %c0_15, %c0_16, %c0_17, %c0_18] : memref<1x2x2x8x8xf32, #tpu.memory_space<vmem>>, vector<1x2x1x8x8xf32>
    %16 = vector.shape_cast %15 : vector<1x2x1x8x8xf32> to vector<2x8x8xf32>
    %17 = vector.shape_cast %14 : vector<2x8x8xf32> to vector<1x2x1x8x8xf32>
    tpu.vector_store %arg7[%c0_14, %c0_15, %c0_16, %c0_17, %c0_18], %17 {strides = array<i32>} : memref<1x2x2x8x8xf32, #tpu.memory_space<vmem>>, vector<1x2x1x8x8xf32>,
    %18 = vector.extract_strided_slice %6 {offsets = [0, 8], sizes = [16, 8], strides = [1, 1]} : vector<16x16xf32> to vector<16x8xf32>
    %c0_19 = arith.constant 0 : index
    %c0_20 = arith.constant 0 : index
    %c1 = arith.constant 1 : index
    %c0_21 = arith.constant 0 : index
    %c0_22 = arith.constant 0 : index
    %19 = vector.load %arg3[%c0_19, %c0_20, %c1, %c0_21, %c0_22] : memref<1x2x2x8x4xf32, #tpu.memory_space<vmem>>, vector<1x2x1x8x4xf32>
    %20 = vector.shape_cast %19 : vector<1x2x1x8x4xf32> to vector<2x8x4xf32>
    %21 = vector.shape_cast %20 : vector<2x8x4xf32> to vector<16x4xf32>
    %c0_23 = arith.constant 0 : index
    %c0_24 = arith.constant 0 : index
    %22 = vector.load %arg5[%c0_23, %c0_24] : memref<4x8xf32, #tpu.memory_space<vmem>>, vector<4x8xf32>
    %cst_25 = arith.constant dense<0.000000e+00> : vector<16x8xf32>
    %23 = tpu.matmul %21, %22, %cst_25 {dimension_numbers = #tpu.dot_dimension_numbers<[1], [0], [0], [1], [0, 0, 1, 1], [], []>} : vector<16x4xf32>, vector<4x8xf32>, vector<16x8xf32> -> vector<16x8xf32>
    %24 = arith.addf %18, %23 : vector<16x8xf32>
    %25 = vector.shape_cast %24 : vector<16x8xf32> to vector<2x8x8xf32>
    %c0_26 = arith.constant 0 : index
    %c0_27 = arith.constant 0 : index
    %c1_28 = arith.constant 1 : index
    %c0_29 = arith.constant 0 : index
    %c0_30 = arith.constant 0 : index
    %26 = vector.load %arg7[%c0_26, %c0_27, %c1_28, %c0_29, %c0_30] : memref<1x2x2x8x8xf32, #tpu.memory_space<vmem>>, vector<1x2x1x8x8xf32>
    %27 = vector.shape_cast %26 : vector<1x2x1x8x8xf32> to vector<2x8x8xf32>
    %28 = vector.shape_cast %25 : vector<2x8x8xf32> to vector<1x2x1x8x8xf32>
    tpu.vector_store %arg7[%c0_26, %c0_27, %c1_28, %c0_29, %c0_30], %28 {strides = array<i32>} : memref<1x2x2x8x8xf32, #tpu.memory_space<vmem>>, vector<1x2x1x8x8xf32>,
    return
  }
  func.func @transform_0(%arg0: i32, %arg1: i32) -> (i32, i32, i32) {
    %c0_i32 = arith.constant 0 : i32
    %c0_i32_0 = arith.constant 0 : i32
    return %arg0, %arg1, %c0_i32 : i32, i32, i32
  }
  func.func @transform_1(%arg0: i32, %arg1: i32) -> (i32, i32, i32, i32, i32) {
    %c0_i32 = arith.constant 0 : i32
    %c0_i32_0 = arith.constant 0 : i32
    %c0_i32_1 = arith.constant 0 : i32
    %c0_i32_2 = arith.constant 0 : i32
    return %arg0, %arg1, %c0_i32, %c0_i32_0, %c0_i32_1 : i32, i32, i32, i32, i32
  }
  func.func @transform_2(%arg0: i32, %arg1: i32) -> (i32, i32) {
    %c0_i32 = arith.constant 0 : i32
    %c0_i32_0 = arith.constant 0 : i32
    %c0_i32_1 = arith.constant 0 : i32
    return %c0_i32, %c0_i32_0 : i32, i32
  }
  func.func @transform_3(%arg0: i32, %arg1: i32) -> (i32, i32) {
    %c0_i32 = arith.constant 0 : i32
    %c0_i32_0 = arith.constant 0 : i32
    %c0_i32_1 = arith.constant 0 : i32
    return %c0_i32, %c0_i32_0 : i32, i32
  }
  func.func @transform_4(%arg0: i32, %arg1: i32) -> (i32, i32) {
    %c0_i32 = arith.constant 0 : i32
    %c0_i32_0 = arith.constant 0 : i32
    %c0_i32_1 = arith.constant 0 : i32
    return %c0_i32, %c0_i32_0 : i32, i32
  }
  func.func @transform_5(%arg0: i32, %arg1: i32) -> (i32, i32, i32, i32, i32) {
    %c0_i32 = arith.constant 0 : i32
    %c0_i32_0 = arith.constant 0 : i32
    %c0_i32_1 = arith.constant 0 : i32
    %c0_i32_2 = arith.constant 0 : i32
    return %arg0, %arg1, %c0_i32, %c0_i32_0, %c0_i32_1 : i32, i32, i32, i32, i32
  }
}

</mosaic_0001>

<bundles_post_ra>
// kernel: tpu_custom_call.1
= control target key start
LH: loop header
LB: loop body
LE: loop exit
PB: predicated region body
PF: predicated region fallthrough
CT: control target
= control target key end

     0   :  { %s1150_s0 = inlined_call_operand.vmem [shape: f32[2,64,4], index: 0, kind: input, shape index: {}]   ;;  %s1151_s1 = inlined_call_operand.vmem [shape: f32[2,8,2,8,4], index: 1, kind: input, shape index: {}]   ;;  %s1152_s2 = inlined_call_operand.vmem [shape: f32[4,16], index: 2, kind: input, shape index: {}]   ;;  %s1153_s3 = inlined_call_operand.vmem [shape: f32[4,8], index: 3, kind: input, shape index: {}]   ;;  %s1154_s4 = inlined_call_operand.vmem [shape: f32[1,16], index: 4, kind: input, shape index: {}]   ;;  %s1155_s5 = inlined_call_operand.hbm [shape: f32[2,8,2,8,8], index: 5, kind: output, shape index: {}]  }
   0x1   :  { %1157 = sst [smem:[#allocation6_spill]] %s1152_s2 }
   0x2   :  { %1158 = sst [smem:[#allocation7_spill]] %s1153_s3 }
   0x3   :  { %10 = vsyncpa [#allocation3], 0 }
   0x4   :  { %12 = vsyncpa [#allocation3 + $0x1], 0  ;;  %s973_s18 = smov 0   ;;  %s975_s19 = smov 0  }
   0x5   :  { %s977_s20 = smov 0   ;;  %s979_s21 = smov 0  }
   0x6   :  { %s981_s22 = smov 0   ;;  %s983_s23 = smov 0  }
   0x7   :  { %s985_s24 = smov 0   ;;  %s987_s25 = smov 0  }
   0x8 LB: > { %s710_s26 = sadd.s32 4294967295, %s937_s25   ;;  %s711_s27 = sadd.s32 4294967294, %s937_s25   ;;  %s937_s25 = sphi %s987_s25, %s18_s25   ;;  %s933_s24 = sphi %s985_s24, %s1171_s24   ;;  %s929_s23 = sphi %s983_s23, %s1170_s23   ;;  %s925_s22 = sphi %s981_s22, %s1169_s22   ;;  %s921_s21 = sphi %s979_s21, %s1168_s21   ;;  %s917_s20 = sphi %s977_s20, %s1167_s20   ;;  %s913_s19 = sphi %s975_s19, %s1166_s19   ;;  %s909_s18 = sphi %s973_s18, %s1165_s18  }
   0x9   : > { %s27_s28 = sadd.s32 1, %s929_s23  ;;  %s30_s29 = sadd.s32 1, %s933_s24 }
   0xa   : > { %p28_p0 = scmp.ge.s32.totalorder %s27_s28, 4  ;;  %p168_p1 = scmp.ne.s32.totalorder %s917_s20, %s913_s19 }
   0xb   : > { %p169_p2 = scmp.eq.s32.totalorder %s710_s26, 7  ;;  %p174_p5 = scmp.ne.s32.totalorder %s913_s19, %s909_s18 }
   0xc   : > { %s1173_s28 = smov (%p28_p0, %s27_s28), 0  ;;  %s1175_s29 = smov (!%p28_p0, %s30_s29), %s933_s24 }
   0xd   : > { %s154_s30 = ssub.s32 %s929_s23, %s1173_s28  ;;  %p1024_p3 = por %p169_p2, %p168_p1 }
   0xe   : > { %p32_p4 = scmp.ge.s32.totalorder %s1175_s29, 2  ;;  %p175_p6 = scmp.eq.s32.totalorder %s711_s27, 7 }
   0xf   : > { %p714_p7 = scmp.ge.s32.totalorder %s937_s25, 1  ;;  %p229_p9 = scmp.lt.s32.totalorder %s937_s25, 9 }
  0x10   : > { %s1177_s29 = smov (%p32_p4, %s1175_s29), 0  ;;  %p1033_p8 = por %p175_p6, %p174_p5 }
  0x11   : > { %1160 = sst [smem:[#allocation5_spill]] %s1177_s29  ;;  %s153_s8 = ssub.s32 %s933_s24, %s1177_s29 }
  0x12   : > { %s158_s9 = sadd.s32 1, %s917_s20  ;;  %s155_s10 = sor.u32 %s154_s30, %s153_s8 }
  0x13   : > { %p230_p10 = pnand %p714_p7, %p229_p9  ;;  %p156_p11 = scmp.eq.s32.totalorder %s155_s10, 0 }
  0x14   : > { %s1162_s2 = sld [smem:[#allocation6_spill]] (!%p230_p10)  ;;  %vm310_vm0 = vcmask (!%p230_p10), 1043456   ;;  %s716_s14 = sshll.u32 (!%p230_p10), %s921_s21, 1  ;;  %vm303_vm1 = vcmask (!%p230_p10), 31744   ;;  %v723_v9 = vld [vmem:[%s1154_s4] ss:$0 sm:$0xff] (!%p230_p10) }
  0x15   : > { %s1042_s11 = scalar_select %p156_p11, %s917_s20, %s158_s9  }
  0x16   : > { %233 = sbr.rel (%p230_p10) target bundleno = 505 (0x1f9), region = 40  ;;  %p272_p12 = scmp.lt.s32.totalorder (!%p230_p10), %s925_s22, 1  ;;  %vm478_vm2 = vcmask (!%p230_p10), 64512  }
  0x17   : > { %p274_p13 = scmp.lt.s32.totalorder (!%p230_p10), %s716_s14, 7  ;;  %s1163_s3 = sld [smem:[#allocation7_spill]] (!%p230_p10) }
  0x1a   : > { %v296_v0 = vld [vmem:[%s1162_s2] sm:$0xf] (!%p230_p10)  ;;  %s268_s2 = sand.u32 (!%p230_p10), 1, %s913_s19  }
  0x1b   : > { %754 = vmatprep.subr.msk.mxu0 (!%p230_p10), %vm310_vm0, %v296_v0 }
  0x1c   : > { %755 = vmatpush3.msk.msra.mxu0 (!%p230_p10), %vm310_vm0, %v296_v0 }
  0x1d   : > { %v484_v1 = vld [vmem:[%s1163_s3] sm:$0xf]  ;;  %s273_s27 = scalar_select %p272_p12, %s925_s22, 1 }
  0x1e   : > { %v391_v2 = vld [vmem:[%s1163_s3] sm:$0xf]  ;;  %s1179_s14 = smov (!%p274_p13, %s716_s14), 7  ;;  %764 = vmatprep.subr.msk.mxu0 %vm310_vm0, %v484_v1  ;;  %s941_s3 = smov [#allocation2]  }
  0x1f   : > { %759 = vmatprep.subr.msk.mxu1 %vm310_vm0, %v391_v2  ;;  %s717_s30 = sshll.u32 %s273_s27, 3  ;;  %s721_s8 = sshll.u32 %s273_s27, 4 }
  0x20   : > { %760 = vmatpush3.msk.msra.mxu1 %vm310_vm0, %v391_v2  ;;  %s277_s9 = sadd.s32 %s717_s30, %s1179_s14  ;;  %s720_s10 = sshll.u32 %s1179_s14, 1 }
  0x21   : > { %s718_s12 = sshll.u32 %s277_s9, 3  ;;  %s288_s13 = sadd.s32 %s721_s8, %s720_s10 }
  0x22   : > { %s279_s17 = scalar_lea.vmem %s1150_s0, %s718_s12  ;;  %s722_s26 = sshll.u32 %s288_s13, 3 }
  0x23   : > { %v293_v3 = vld [vmem:[%s279_s17] sm:$0xff]  ;;  %v294_v4 = vld [vmem:[%s279_s17 + $0x8] sm:$0xff]  ;;  %s290_s29 = scalar_lea.vmem %s1151_s1, %s722_s26  ;;  %s715_s27 = sshll.u32 %s268_s2, 5 }
  0x24   : > { %756 = vmatprep.mubr.msk.f32.mxu0 %vm303_vm1, %v293_v3  ;;  %v389_v5 = vld [vmem:[%s290_s29] sm:$0xff]  ;;  %v390_v6 = vld [vmem:[%s290_s29 + $0x10] sm:$0xff]  ;;  %v730_v7 = vld [vmem:[%s290_s29 + $0x8] sm:$0xff]  ;;  %s939_s30 = smov 8   ;;  %s940_s8 = smov 120  }
  0x25   : > { %757 = vmatmul.mubr.msk.f32.vlgmr.msra.gmra.mrb[0].mxu0 %vm303_vm1, %v294_v4  ;;  %761 = vmatprep.mubr.msk.f32.mxu1 %vm303_vm1, %v389_v5  ;;  %v731_v8 = vld [vmem:[%s290_s29 + $0x18] sm:$0xff]  ;;  %s270_s29 = scalar_lea.vmem [#allocation2], %s715_s27  ;;  %s744_s9 = sshll.u32 %s921_s21, 2 }
  0x26   : > { %765 = vmatpush3.msk.msra.mxu0 %vm310_vm0, %v484_v1  ;;  %762 = vmatmul.mubr.msk.f32.vlgmr.msra.gmra.mrb[0].mxu1 %vm303_vm1, %v390_v6  ;;  %s740_s10 = sshll.u32 %s925_s22, 4  ;;  %s607_s13 = sshll.u32 %s270_s29, 4  ;;  %s1087_s13 = int_to_ptr.vmem [resolvable:$true] %s607_s13 }
  0x27   : > { %766 = vmatprep.mubr.msk.f32.mxu0 %vm303_vm1, %v730_v7  ;;  %s604_s12 = sadd.s32 %s744_s9, %s740_s10  ;;  %s1097_s21 = scalar_lea.sflag [#allocation3], %s268_s2 }
  0x28   : > { %s741_s15 = sshll.u32 %s604_s12, 7  ;;  %s843_s22 = scalar_lea.vmem %s1087_s13, 512 }
  0x29   : > { %767 = vmatmul.mubr.msk.f32.vlgmr.msra.gmra.mrb[2].mxu0 %vm303_vm1, %v731_v8  ;;  %s1092_s26 = scalar_lea.hbm %s1155_s5, %s741_s15  ;;  %p844_p0 = scmp.ne.s32.totalorder %s1087_s13, %s843_s22 }
  0x2a   : > { %s847_s14 = sshll.u32 %s941_s3, 4  ;;  %s848_s14 = int_to_ptr.vmem [resolvable:$false] %s847_s14 }
  0x2b   : > { %p845_p1 = pnand %p844_p0, %p1024_p3  ;;  %s849_s27 = scalar_lea.vmem %s848_s14, 1024 }
  0x2c   : > { %p850_p4 = scmp.lt.s32.totalorder %s1087_s13, %s848_s14  ;;  %p851_p5 = scmp.lt.s32.totalorder %s849_s27, %s843_s22 }
  0x2d   : > { %p846_p2 = pneg %p845_p1 }
  0x2e   : > { %p852_p6 = por %p851_p5, %p850_p4 }
  0x30   : > { %p853_p7 = pnand %p852_p6, %p846_p2 }
  0xf8   : > { %v758_v10 = vpop.f32.mrb[0].mxu0 }
  0xf9   : > { %v386_v11 = vadd.f32 %v758_v10, %v723_v9  ;;  %v380_v12 = vpop.f32.mrb[1].mxu0  ;;  %v763_v13 = vpop.f32.mrb[0].mxu1 }
  0xfa   : > { %v381_v14 = vadd.f32 %v723_v9, %v380_v12  ;;  %v467_v15 = vpop.f32.mrb[1].mxu1 }
  0xfb   : > { %v477_v16 = vadd.f32 %v763_v13, %v386_v11 }
  0xfc   : > { %v476_v17 = vadd.f32 %v467_v15, %v381_v14  ;;  %v768_v18 = vpop.f32.mrb[2].mxu0 }
  0xfd   : > { %480 = vst.msk [vmem:[%s270_s29 + $0x10] sm:$0xff] %vm478_vm2, %v477_v16  ;;  %v560_v19 = vpop.f32.mrb[3].mxu0 }
  0xfe   : > { %479 = vst.msk [vmem:[%s270_s29] sm:$0xff] %vm478_vm2, %v476_v17  ;;  %571 = vrot.lane.b32.xlu0 %v560_v19, %s939_s30 }
 0x102   : > { %573 = vrot.lane.b32.xlu0 %v768_v18, %s939_s30 }
 0x170   : > { %v572_v20 = vpop.permute.xlu0 %571 }
 0x171   : > { %v577_v21 = vadd.f32 %v572_v20, %v381_v14 }
 0x173   : > { %581 = vrot.lane.b32.xlu1 %v577_v21, %s940_s8 }
 0x174   : > { %v574_v22 = vpop.permute.xlu0 %573 }
 0x175   : > { %v578_v23 = vadd.f32 %v574_v22, %v386_v11 }
 0x177   : > { %583 = vrot.lane.b32.xlu1 %v578_v23, %s940_s8 }
 0x1e5   : > { %v582_v24 = vpop.permute.xlu1 %581 }
 0x1e6   : > { %735 = vst.msk [vmem:[%s270_s29 + $0x8] sm:$0xff] %vm478_vm2, %v582_v24 }
 0x1e9   : > { %v584_v25 = vpop.permute.xlu1 %583 }
 0x1ea   : > { %736 = vst.msk [vmem:[%s270_s29 + $0x18] sm:$0xff] %vm478_vm2, %v584_v25 }
 0x1eb   : > { %856 = shalt.err (!%p853_p7)
}
 0x1ec   : > { %s857_s2 = scalar_lea.hbm %s1092_s26, 512  ;;  %s861_s9 = scalar_lea.hbm %s1155_s5, 4096 }
 0x1ed   : > { %p858_p9 = scmp.ne.s32.totalorder %s1092_s26, %s857_s2  ;;  %p862_p12 = scmp.lt.u32.totalorder %s1092_s26, %s1155_s5 }
 0x1ee   : > { %p863_p13 = scmp.lt.u32.totalorder %s861_s9, %s857_s2  ;;  %p865_p1 = scmp.lt.u32.totalorder %s857_s2, %s1092_s26 }
 0x1ef   : > { %p859_p10 = pnand %p858_p9, %p1024_p3 }
 0x1f0   : > { %p864_p0 = por %p863_p13, %p862_p12 }
 0x1f1   : > { %p860_p11 = pneg %p859_p10 }
 0x1f2   : > { %p866_p2 = por %p865_p1, %p864_p0 }
 0x1f4   : > { %p867_p4 = pnand %p866_p2, %p860_p11 }
 0x1f6   : > { %870 = shalt.err (!%p867_p4)
}
 0x1f7   : > { %s942_s15 = smov 128  }
 0x1f8   : > { %769 = dma.vmem_to_hbm [thread:$0]  (%p1024_p3), %s1087_s13, 512, %s1092_s26, %s1097_s21, %s942_s15, %s942_s15, %s939_s30  }
 0x1f9 PF: > { %p775_p5 = scmp.ge.s32.totalorder %s937_s25, 2  ;;  %s622_s16 = sand.u32 1, %s909_s18  }
 0x1fa   : > { %s623_s17 = scalar_lea.sflag [#allocation3], %s622_s16 }
 0x1fb   : > { %p772_p6 = pnand %p775_p5, %p1033_p8 }
 0x1fd   : > { %904 = dma.done.wait (!%p772_p6), %s623_s17, 512  }
 0x1fe   : > { %906 = vsyncadd (!%p772_p6), %s623_s17, 4294966784  ;;  %s18_s25 = sadd.s32 1, %s937_s25   ;;  %s1164_s6 = sld [smem:[#allocation5_spill]] }
 0x1ff   : > { %p15_p7 = scmp.ge.s32.totalorder %s18_s25, 10   ;;  %s1165_s18 = smov %s913_s19 }
 0x200   : > { %s1166_s19 = smov %s917_s20  ;;  %s1167_s20 = smov %s1042_s11 }
 0x201   : > { %s1168_s21 = smov %s929_s23  ;;  %s1169_s22 = smov %s933_s24 }
 0x202   : > { %s1170_s23 = smov %s1173_s28  ;;  %17 = sbr.rel (!%p15_p7) target bundleno = 8 (0x8), region = 80 }
 0x204   : > { %s1171_s24 = smov %s1164_s6 }
 0x209   :  { %628 = vsyncpa [#allocation3], 1 }
 0x20a   :  { %630 = vsyncpa [#allocation3 + $0x1], 1 }

</bundles_post_ra>
